<compile_context>
chip_gen: v5e
topology: v5e:2x2
jax: 0.10.0
libtpu: 0.0.40
codegen_flags: <defaults>
</compile_context>

<pallas_src>
import numpy as np
import jax
import jax.numpy as jnp
from jax.experimental import pallas as pl
from jax.experimental.pallas import tpu as pltpu

NEG_DIAG = -9999999.0
LEAKY_SLOPE = 0.01   # PyTorch nn.LeakyReLU default


# --------------------------------------------------------------------------
# Pallas kernel: one block of `DB` documents per grid step.
# --------------------------------------------------------------------------
def _doc_block_kernel(x_ref,                       # (DB, S, D) last-word embeds
                      wsT_ref, bs_ref,             # (D, H), (1, H)
                      wpcT_ref, bpc_ref,           # (H, 2H), (1, 2H)  parent|child fused
                      wrT_ref, br_ref,             # (H, 1), (1, 1)    root score
                      root_ref,                    # (1, H)            root embed
                      wr1T_ref, wr2T_ref, wr3T_ref, br2_ref,  # (H,H)x3, (1,H)
                      wfT_ref, bf_ref,             # (H, 2), (1, 2)    classifier
                      out_ref):                    # (DB, S+1, LANE) packed outputs
    f32 = jnp.float32

    def leaky(v):
        return jnp.where(v > 0, v, LEAKY_SLOPE * v)

    DB, S, D = x_ref.shape
    H = root_ref.shape[1]

    # Flatten docs*sentences for all shared linears (M = DB*S rows on the MXU).
    # (For large H / batches on v6e/v7x, cast matmul operands to bf16 here and
    #  keep f32 accumulation + f32 elementwise; not worth it at these sizes.)
    x = x_ref[...].reshape(DB * S, D)

    # sentence_encoder: Linear(D->H) + LeakyReLU (+ dropout = identity)
    enc = leaky(jnp.dot(x, wsT_ref[...],
                        preferred_element_type=f32) + bs_ref[...])          # (DB*S, H)

    # parent & child encoders fused into a single matmul (weights stacked).
    pc = leaky(jnp.dot(enc, wpcT_ref[...],
                       preferred_element_type=f32) + bpc_ref[...])          # (DB*S, 2H)
    parent = pc[:, :H].reshape(DB, S, H)
    child = pc[:, H:].reshape(DB, S, H)

    # A[b, i, j] = dot(parent_i, child_j); diagonal forced to -9999999.0
    a = jnp.einsum('bih,bjh->bij', parent, child,
                   preferred_element_type=f32)                              # (DB, S, S)
    row_i = jax.lax.broadcasted_iota(jnp.int32, (DB, S, S), 1)
    col_i = jax.lax.broadcasted_iota(jnp.int32, (DB, S, S), 2)
    a = jnp.where(row_i == col_i, NEG_DIAG, a)

    # Softmax over dim 0 of each (S, S) matrix  -> axis=1 of (b, i, j)
    a = jnp.exp(a - jnp.max(a, axis=1, keepdims=True))
    a = a * pl.reciprocal(jnp.sum(a, axis=1, keepdims=True), approx=True)

    # fri = Softmax(dim=0)(root_score_encoder(enc))  -> (DB, S, 1)
    fr = jnp.dot(enc, wrT_ref[...], preferred_element_type=f32) + br_ref[...]
    fr = fr.reshape(DB, S, 1)
    fr = jnp.exp(fr - jnp.max(fr, axis=1, keepdims=True))
    fr = fr * pl.reciprocal(jnp.sum(fr, axis=1, keepdims=True), approx=True)

    enc3 = enc.reshape(DB, S, H)
    # tmp_i  = sum_k A[k, i] * enc_k   (A^T @ enc per doc, via dot_general)
    tmp = jnp.einsum('bki,bkh->bih', a, enc3, preferred_element_type=f32)    # (DB, S, H)
    # tmp2_i = fri_i * root_embed
    tmp2 = fr * root_ref[...]                                                # (DB, S, H)
    # tmp3_i = (sum_k A[i, k]) * enc_i
    tmp3 = jnp.sum(a, axis=2, keepdims=True) * enc3                          # (DB, S, H)

    # r_embeds_doc on [enc | tmp+tmp2 | tmp3]: the 3H concatenate is replaced
    # by three (H, H) matmuls summed (Wr was split column-wise in the wrapper).
    ri = leaky(
        jnp.dot(enc, wr1T_ref[...], preferred_element_type=f32)
        + jnp.dot((tmp + tmp2).reshape(DB * S, H), wr2T_ref[...],
                  preferred_element_type=f32)
        + jnp.dot(tmp3.reshape(DB * S, H), wr3T_ref[...],
                  preferred_element_type=f32)
        + br2_ref[...])                                                      # (DB*S, H)

    final = jnp.sum(ri.reshape(DB, S, H), axis=1) * (1.0 / S)                # (DB, H)
    logits = jnp.dot(final, wfT_ref[...],
                     preferred_element_type=f32) + bf_ref[...]               # (DB, 2)

    # Pack outputs into one lane-dense slab:
    #   rows 0..S-1 : [ A (S cols) | fri (1 col) | zero pad ]
    #   row  S      : [ logits (2 cols)          | zero pad ]
    out_ref[...] = jnp.zeros(out_ref.shape, out_ref.dtype)
    out_ref[:, 0:S, 0:S] = a
    out_ref[:, 0:S, S:S + 1] = fr
    out_ref[:, S:S + 1, 0:2] = logits[:, None, :]


def dependency_blstm_forward(last_embeds, params, docs_per_block=None):
    """last_embeds: (B, S, D) float32 last-word embeddings per sentence.

    Returns (logits (B, 2), Aij (B, S, S), fri (B, S, 1))."""
    B, S, D = last_embeds.shape
    H = params["Ws"].shape[0]

    if docs_per_block is None:
        # Batch many docs per grid step, but keep >= 2 grid steps when B > 1 so
        # both v7x TensorCores get work (grid axis is 'parallel').
        docs_per_block = max(1, pl.cdiv(B, 2))
    grid_b = pl.cdiv(B, docs_per_block)
    b_padded = grid_b * docs_per_block

    x = last_embeds.astype(jnp.float32)
    if b_padded != B:
        x = jnp.concatenate(
            [x, jnp.zeros((b_padded - B, S, D), jnp.float32)], axis=0)

    # One-time weight preprocessing (outside the kernel): pre-transpose, fuse
    # parent/child into one (H, 2H), split the 3H->H projection into three
    # (H, H) blocks -> the kernel does no transposes / concatenates.
    wsT = params["Ws"].T                                            # (D, H)
    wpcT = jnp.concatenate([params["Wp"].T, params["Wc"].T], axis=1)  # (H, 2H)
    bpc = jnp.concatenate([params["bp"], params["bc"]], axis=1)       # (1, 2H)
    wrT = params["wr"].T                                            # (H, 1)
    wrpT = params["Wr"].T                                           # (3H, H)
    wr1T, wr2T, wr3T = wrpT[:H], wrpT[H:2 * H], wrpT[2 * H:]
    wfT = params["Wf"].T                                            # (H, 2)

    weights = [wsT, params["bs"], wpcT, bpc, wrT, params["br"],
               params["root"], wr1T, wr2T, wr3T, params["br2"],
               wfT, params["bf"]]

    # Grid-invariant weight blocks (constant index map => fetched once, not
    # re-DMA'd per grid step).
    def const_spec(arr):
        n = arr.ndim
        return pl.BlockSpec(arr.shape, lambda g, _n=n: (0,) * _n)

    lane = 128 * pl.cdiv(S + 1, 128)      # lane-dense packed output width

    out = pl.pallas_call(
        _doc_block_kernel,
        out_shape=jax.ShapeDtypeStruct((b_padded, S + 1, lane), jnp.float32),
        grid_spec=pltpu.PrefetchScalarGridSpec(
            num_scalar_prefetch=0,
            grid=(grid_b,),
            in_specs=[pl.BlockSpec((docs_per_block, S, D),
                                   lambda g: (g, 0, 0))]
                     + [const_spec(w) for w in weights],
            out_specs=pl.BlockSpec((docs_per_block, S + 1, lane),
                                   lambda g: (g, 0, 0)),
        ),
        compiler_params=pltpu.CompilerParams(
            dimension_semantics=("parallel",)),
    )(x, *weights)

    out = out[:B]
    a = out[:, :S, :S]
    fri = out[:, :S, S:S + 1]
    logits = out[:, S, :2]
    return logits, a, fri


# --------------------------------------------------------------------------
# Deterministic parameter init (shapes from the module __init__).
# --------------------------------------------------------------------------
def init_params(key, num_words, D, H):
    ks = jax.random.split(key, 8)

    def linear(k, out_dim, in_dim):
        bound = 1.0 / float(np.sqrt(in_dim))
        kw, kb = jax.random.split(k)
        w = jax.random.uniform(kw, (out_dim, in_dim), jnp.float32, -bound, bound)
        b = jax.random.uniform(kb, (1, out_dim), jnp.float32, -bound, bound)
        return w, b

    p = {}
    p["emb"] = 0.1 * jax.random.normal(ks[0], (num_words, D), jnp.float32)
    p["Ws"], p["bs"] = linear(ks[1], H, D)         # sentence_encoder
    p["Wp"], p["bp"] = linear(ks[2], H, H)         # parent_encoder_doc
    p["Wc"], p["bc"] = linear(ks[3], H, H)         # child_encoder_doc
    p["wr"], p["br"] = linear(ks[4], 1, H)         # root_score_encoder_doc
    p["root"] = jnp.zeros((1, H), jnp.float32)     # root_embed_doc (zeros init)
    p["Wr"], p["br2"] = linear(ks[5], H, 3 * H)    # r_embeds_doc
    p["Wf"], p["bf"] = linear(ks[6], 2, H)         # final_binary_classifier
    return p


# --------------------------------------------------------------------------
# Pure-JAX reference (same math) for a correctness check.
# --------------------------------------------------------------------------
def ref_forward(last_embeds, p):
    def leaky(v):
        return jnp.where(v > 0, v, LEAKY_SLOPE * v)

    def per_doc(x):
        enc = leaky(x @ p["Ws"].T + p["bs"])
        parent = leaky(enc @ p["Wp"].T + p["bp"])
        child = leaky(enc @ p["Wc"].T + p["bc"])
        a = parent @ child.T
        s = a.shape[0]
        a = jnp.where(jnp.eye(s, dtype=bool), NEG_DIAG, a)
        a = jax.nn.softmax(a, axis=0)
        fr = jax.nn.softmax(enc @ p["wr"].T + p["br"], axis=0)
        tmp = a.T @ enc
        tmp2 = fr * p["root"]
        tmp3 = jnp.sum(a, axis=1, keepdims=True) * enc
        feat = jnp.concatenate([enc, tmp + tmp2, tmp3], axis=1)
        ri = leaky(feat @ p["Wr"].T + p["br2"])
        final = jnp.mean(ri, axis=0)
        logits = final @ p["Wf"].T + p["bf"][0]
        return logits, a, fr

    return jax.vmap(per_doc)(last_embeds)


if __name__ == "__main__":
    # Small synthetic config consistent with the module's forward.
    NUM_WORDS = 33000          # nn.Embedding(num_embeddings=33000, ...)
    D = 32                     # args.word_dim
    H = 32                     # args.blstm_hidden_unit_dim
    B = 4                      # number of docs  (-> 2 grid steps x 2 docs/block)
    S = 8                      # sentences per doc (max_doc_sent_length)
    L = 8                      # max_sen_length

    key = jax.random.PRNGKey(0)
    k_param, k_idx, k_len = jax.random.split(key, 3)

    params = init_params(k_param, NUM_WORDS, D, H)

    # Synthetic docs: word indices (B, S, L) and true sentence lengths (B, S).
    word_indices = jax.random.randint(k_idx, (B, S, L), 0, NUM_WORDS)
    seq_lengths = jax.random.randint(k_len, (B, S), 1, L + 1)

    # Glue (embedding lookup = gather; dropout is identity in eval mode).
    # The effective per-sentence encoder input is the LAST word's embedding.
    last_word_idx = jnp.take_along_axis(
        word_indices, (seq_lengths - 1)[..., None], axis=2)[..., 0]   # (B, S)
    last_embeds = params["emb"][last_word_idx].astype(jnp.float32)    # (B, S, D)

    # TODO(synk): forwardLSTM_sent / backwardLSTM_sent outputs are never used
    # in the original forward (the zip iterates over the raw embeddings), so
    # the LSTMs are intentionally omitted.

    logits, a, fri = dependency_blstm_forward(last_embeds, params)
    logits = jax.block_until_ready(logits)

    ref_logits, ref_a, ref_fri = ref_forward(last_embeds, params)
    # Tolerance accommodates the EUP approximate reciprocal used for the
    # softmax normalizations (pl.reciprocal(..., approx=True)).
    np.testing.assert_allclose(np.asarray(logits), np.asarray(ref_logits),
                               rtol=5e-3, atol=5e-3)
    np.testing.assert_allclose(np.asarray(a), np.asarray(ref_a),
                               rtol=5e-3, atol=5e-3)
    np.testing.assert_allclose(np.asarray(fri), np.asarray(ref_fri),
                               rtol=5e-3, atol=5e-3)

    print("KERNEL_OK")
</pallas_src>

<mosaic_0001>
module attributes {stable_mosaic.version = 11 : i64} {
  func.func @_doc_block_kernel(%arg0: i32, %arg1: memref<2x8x32xf32, #tpu.memory_space<vmem>>, %arg2: memref<32x32xf32, #tpu.memory_space<vmem>>, %arg3: memref<1x32xf32, #tpu.memory_space<vmem>>, %arg4: memref<32x64xf32, #tpu.memory_space<vmem>>, %arg5: memref<1x64xf32, #tpu.memory_space<vmem>>, %arg6: memref<32x1xf32, #tpu.memory_space<vmem>>, %arg7: memref<1x1xf32, #tpu.memory_space<vmem>>, %arg8: memref<1x32xf32, #tpu.memory_space<vmem>>, %arg9: memref<32x32xf32, #tpu.memory_space<vmem>>, %arg10: memref<32x32xf32, #tpu.memory_space<vmem>>, %arg11: memref<32x32xf32, #tpu.memory_space<vmem>>, %arg12: memref<1x32xf32, #tpu.memory_space<vmem>>, %arg13: memref<32x2xf32, #tpu.memory_space<vmem>>, %arg14: memref<1x2xf32, #tpu.memory_space<vmem>>, %arg15: memref<2x9x128xf32, #tpu.memory_space<vmem>>) attributes {dimension_semantics = [#tpu.dimension_semantics<parallel>], iteration_bounds = array<i64: 2>, scalar_prefetch = 0 : i64, scratch_operands = 0 : i64, tpu.core_type = #tpu.core_type<tc>, window_params = [{transform_indices = @transform_0, window_bounds = array<i64: 2, 8, 32>}, {pipeline_mode = #tpu.pipeline_mode<synchronous>, transform_indices = @transform_1, window_bounds = array<i64: 32, 32>}, {pipeline_mode = #tpu.pipeline_mode<synchronous>, transform_indices = @transform_2, window_bounds = array<i64: 1, 32>}, {pipeline_mode = #tpu.pipeline_mode<synchronous>, transform_indices = @transform_3, window_bounds = array<i64: 32, 64>}, {pipeline_mode = #tpu.pipeline_mode<synchronous>, transform_indices = @transform_4, window_bounds = array<i64: 1, 64>}, {pipeline_mode = #tpu.pipeline_mode<synchronous>, transform_indices = @transform_5, window_bounds = array<i64: 32, 1>}, {pipeline_mode = #tpu.pipeline_mode<synchronous>, transform_indices = @transform_6, window_bounds = array<i64: 1, 1>}, {pipeline_mode = #tpu.pipeline_mode<synchronous>, transform_indices = @transform_7, window_bounds = array<i64: 1, 32>}, {pipeline_mode = #tpu.pipeline_mode<synchronous>, transform_indices = @transform_8, window_bounds = array<i64: 32, 32>}, {pipeline_mode = #tpu.pipeline_mode<synchronous>, transform_indices = @transform_9, window_bounds = array<i64: 32, 32>}, {pipeline_mode = #tpu.pipeline_mode<synchronous>, transform_indices = @transform_10, window_bounds = array<i64: 32, 32>}, {pipeline_mode = #tpu.pipeline_mode<synchronous>, transform_indices = @transform_11, window_bounds = array<i64: 1, 32>}, {pipeline_mode = #tpu.pipeline_mode<synchronous>, transform_indices = @transform_12, window_bounds = array<i64: 32, 2>}, {pipeline_mode = #tpu.pipeline_mode<synchronous>, transform_indices = @transform_13, window_bounds = array<i64: 1, 2>}, {transform_indices = @transform_14, window_bounds = array<i64: 2, 9, 128>}]} {
    %c0 = arith.constant 0 : index
    %c0_0 = arith.constant 0 : index
    %c0_1 = arith.constant 0 : index
    %0 = vector.load %arg1[%c0, %c0_0, %c0_1] : memref<2x8x32xf32, #tpu.memory_space<vmem>>, vector<2x8x32xf32>
    %1 = vector.shape_cast %0 : vector<2x8x32xf32> to vector<16x32xf32>
    %c0_2 = arith.constant 0 : index
    %c0_3 = arith.constant 0 : index
    %2 = vector.load %arg2[%c0_2, %c0_3] : memref<32x32xf32, #tpu.memory_space<vmem>>, vector<32x32xf32>
    %cst = arith.constant dense<0.000000e+00> : vector<16x32xf32>
    %3 = tpu.matmul %1, %2, %cst {dimension_numbers = #tpu.dot_dimension_numbers<[1], [0], [0], [1], [0, 0, 1, 1], [], []>} : vector<16x32xf32>, vector<32x32xf32>, vector<16x32xf32> -> vector<16x32xf32>
    %c0_4 = arith.constant 0 : index
    %c0_5 = arith.constant 0 : index
    %4 = vector.load %arg3[%c0_4, %c0_5] : memref<1x32xf32, #tpu.memory_space<vmem>>, vector<1x32xf32>
    %5 = vector.broadcast %4 : vector<1x32xf32> to vector<16x32xf32>
    %6 = arith.addf %3, %5 : vector<16x32xf32>
    %cst_6 = arith.constant 0.000000e+00 : f32
    %7 = vector.broadcast %cst_6 : f32 to vector<16x32xf32>
    %8 = arith.cmpf ogt, %6, %7 : vector<16x32xf32>
    %cst_7 = arith.constant 0.00999999977 : f32
    %9 = vector.broadcast %cst_7 : f32 to vector<16x32xf32>
    %10 = arith.mulf %9, %6 : vector<16x32xf32>
    %11 = arith.select %8, %6, %10 : vector<16x32xi1>, vector<16x32xf32>
    %c0_8 = arith.constant 0 : index
    %c0_9 = arith.constant 0 : index
    %12 = vector.load %arg4[%c0_8, %c0_9] : memref<32x64xf32, #tpu.memory_space<vmem>>, vector<32x64xf32>
    %cst_10 = arith.constant dense<0.000000e+00> : vector<16x64xf32>
    %13 = tpu.matmul %11, %12, %cst_10 {dimension_numbers = #tpu.dot_dimension_numbers<[1], [0], [0], [1], [0, 0, 1, 1], [], []>} : vector<16x32xf32>, vector<32x64xf32>, vector<16x64xf32> -> vector<16x64xf32>
    %c0_11 = arith.constant 0 : index
    %c0_12 = arith.constant 0 : index
    %14 = vector.load %arg5[%c0_11, %c0_12] : memref<1x64xf32, #tpu.memory_space<vmem>>, vector<1x64xf32>
    %15 = vector.broadcast %14 : vector<1x64xf32> to vector<16x64xf32>
    %16 = arith.addf %13, %15 : vector<16x64xf32>
    %cst_13 = arith.constant 0.000000e+00 : f32
    %17 = vector.broadcast %cst_13 : f32 to vector<16x64xf32>
    %18 = arith.cmpf ogt, %16, %17 : vector<16x64xf32>
    %cst_14 = arith.constant 0.00999999977 : f32
    %19 = vector.broadcast %cst_14 : f32 to vector<16x64xf32>
    %20 = arith.mulf %19, %16 : vector<16x64xf32>
    %21 = arith.select %18, %16, %20 : vector<16x64xi1>, vector<16x64xf32>
    %22 = vector.extract_strided_slice %21 {offsets = [0, 0], sizes = [16, 32], strides = [1, 1]} : vector<16x64xf32> to vector<16x32xf32>
    %23 = vector.shape_cast %22 : vector<16x32xf32> to vector<2x8x32xf32>
    %24 = vector.extract_strided_slice %21 {offsets = [0, 32], sizes = [16, 32], strides = [1, 1]} : vector<16x64xf32> to vector<16x32xf32>
    %25 = vector.shape_cast %24 : vector<16x32xf32> to vector<2x8x32xf32>
    "tpu.trace_start"() <{level = 10 : i32, message = "bih,bjh->bij"}> : () -> ()
    %cst_15 = arith.constant dense<0.000000e+00> : vector<2x8x8xf32>
    %26 = tpu.matmul %23, %25, %cst_15 {dimension_numbers = #tpu.dot_dimension_numbers<[2], [2], [1], [1], [0, 0, 0, 1, 1, 1], [0], [0]>} : vector<2x8x32xf32>, vector<2x8x32xf32>, vector<2x8x8xf32> -> vector<2x8x8xf32>
    "tpu.trace_stop"() : () -> ()
    %27 = tpu.iota {dimensions = array<i32: 1>} : vector<2x8x8xi32>
    %28 = tpu.iota {dimensions = array<i32: 2>} : vector<2x8x8xi32>
    %29 = arith.cmpi eq, %27, %28 : vector<2x8x8xi32>
    %cst_16 = arith.constant 0xCB18967F : f32
    %30 = vector.broadcast %cst_16 : f32 to vector<2x8x8xf32>
    %31 = arith.select %29, %30, %26 : vector<2x8x8xi1>, vector<2x8x8xf32>
    %cst_17 = arith.constant dense<0xFF800000> : vector<2x8xf32>
    %32 = vector.multi_reduction <maximumf>, %31, %cst_17 [1] : vector<2x8x8xf32> to vector<2x8xf32>
    %33 = vector.shape_cast %32 : vector<2x8xf32> to vector<2x1x8xf32>
    %34 = vector.broadcast %33 : vector<2x1x8xf32> to vector<2x8x8xf32>
    %35 = arith.subf %31, %34 : vector<2x8x8xf32>
    %36 = math.exp %35 : vector<2x8x8xf32>
    %cst_18 = arith.constant dense<0.000000e+00> : vector<2x8xf32>
    %37 = vector.multi_reduction <add>, %36, %cst_18 [1] : vector<2x8x8xf32> to vector<2x8xf32>
    %38 = vector.shape_cast %37 : vector<2x8xf32> to vector<2x1x8xf32>
    %39 = tpu.reciprocal %38 {approx = true} : vector<2x1x8xf32> -> vector<2x1x8xf32>
    %40 = vector.broadcast %39 : vector<2x1x8xf32> to vector<2x8x8xf32>
    %41 = arith.mulf %36, %40 : vector<2x8x8xf32>
    %c0_19 = arith.constant 0 : index
    %c0_20 = arith.constant 0 : index
    %42 = vector.load %arg6[%c0_19, %c0_20] : memref<32x1xf32, #tpu.memory_space<vmem>>, vector<32x1xf32>
    %cst_21 = arith.constant dense<0.000000e+00> : vector<16x1xf32>
    %43 = tpu.matmul %11, %42, %cst_21 {dimension_numbers = #tpu.dot_dimension_numbers<[1], [0], [0], [1], [0, 0, 1, 1], [], []>} : vector<16x32xf32>, vector<32x1xf32>, vector<16x1xf32> -> vector<16x1xf32>
    %c0_22 = arith.constant 0 : index
    %c0_23 = arith.constant 0 : index
    %44 = vector.load %arg7[%c0_22, %c0_23] : memref<1x1xf32, #tpu.memory_space<vmem>>, vector<1x1xf32>
    %45 = vector.broadcast %44 : vector<1x1xf32> to vector<16x1xf32>
    %46 = arith.addf %43, %45 : vector<16x1xf32>
    %47 = vector.shape_cast %46 : vector<16x1xf32> to vector<2x8x1xf32>
    %cst_24 = arith.constant dense<0xFF800000> : vector<2x1xf32>
    %48 = vector.multi_reduction <maximumf>, %47, %cst_24 [1] : vector<2x8x1xf32> to vector<2x1xf32>
    %49 = vector.shape_cast %48 : vector<2x1xf32> to vector<2x1x1xf32>
    %50 = vector.broadcast %49 : vector<2x1x1xf32> to vector<2x8x1xf32>
    %51 = arith.subf %47, %50 : vector<2x8x1xf32>
    %52 = math.exp %51 : vector<2x8x1xf32>
    %cst_25 = arith.constant dense<0.000000e+00> : vector<2x1xf32>
    %53 = vector.multi_reduction <add>, %52, %cst_25 [1] : vector<2x8x1xf32> to vector<2x1xf32>
    %54 = vector.shape_cast %53 : vector<2x1xf32> to vector<2x1x1xf32>
    %55 = tpu.reciprocal %54 {approx = true} : vector<2x1x1xf32> -> vector<2x1x1xf32>
    %56 = vector.broadcast %55 : vector<2x1x1xf32> to vector<2x8x1xf32>
    %57 = arith.mulf %52, %56 : vector<2x8x1xf32>
    %58 = vector.shape_cast %11 : vector<16x32xf32> to vector<2x8x32xf32>
    "tpu.trace_start"() <{level = 10 : i32, message = "bki,bkh->bih"}> : () -> ()
    %cst_26 = arith.constant dense<0.000000e+00> : vector<2x8x32xf32>
    %59 = tpu.matmul %41, %58, %cst_26 {dimension_numbers = #tpu.dot_dimension_numbers<[1], [1], [2], [2], [0, 0, 0, 2, 1, 2], [0], [0]>} : vector<2x8x8xf32>, vector<2x8x32xf32>, vector<2x8x32xf32> -> vector<2x8x32xf32>
    "tpu.trace_stop"() : () -> ()
    %c0_27 = arith.constant 0 : index
    %c0_28 = arith.constant 0 : index
    %60 = vector.load %arg8[%c0_27, %c0_28] : memref<1x32xf32, #tpu.memory_space<vmem>>, vector<1x32xf32>
    %61 = vector.shape_cast %60 : vector<1x32xf32> to vector<1x1x32xf32>
    %62 = vector.broadcast %57 : vector<2x8x1xf32> to vector<2x8x32xf32>
    %63 = vector.broadcast %61 : vector<1x1x32xf32> to vector<2x8x32xf32>
    %64 = arith.mulf %62, %63 : vector<2x8x32xf32>
    %cst_29 = arith.constant dense<0.000000e+00> : vector<2x8xf32>
    %65 = vector.multi_reduction <add>, %41, %cst_29 [2] : vector<2x8x8xf32> to vector<2x8xf32>
    %66 = vector.shape_cast %65 : vector<2x8xf32> to vector<2x8x1xf32>
    %67 = vector.broadcast %66 : vector<2x8x1xf32> to vector<2x8x32xf32>
    %68 = arith.mulf %67, %58 : vector<2x8x32xf32>
    %c0_30 = arith.constant 0 : index
    %c0_31 = arith.constant 0 : index
    %69 = vector.load %arg9[%c0_30, %c0_31] : memref<32x32xf32, #tpu.memory_space<vmem>>, vector<32x32xf32>
    %cst_32 = arith.constant dense<0.000000e+00> : vector<16x32xf32>
    %70 = tpu.matmul %11, %69, %cst_32 {dimension_numbers = #tpu.dot_dimension_numbers<[1], [0], [0], [1], [0, 0, 1, 1], [], []>} : vector<16x32xf32>, vector<32x32xf32>, vector<16x32xf32> -> vector<16x32xf32>
    %71 = arith.addf %59, %64 : vector<2x8x32xf32>
    %72 = vector.shape_cast %71 : vector<2x8x32xf32> to vector<16x32xf32>
    %c0_33 = arith.constant 0 : index
    %c0_34 = arith.constant 0 : index
    %73 = vector.load %arg10[%c0_33, %c0_34] : memref<32x32xf32, #tpu.memory_space<vmem>>, vector<32x32xf32>
    %cst_35 = arith.constant dense<0.000000e+00> : vector<16x32xf32>
    %74 = tpu.matmul %72, %73, %cst_35 {dimension_numbers = #tpu.dot_dimension_numbers<[1], [0], [0], [1], [0, 0, 1, 1], [], []>} : vector<16x32xf32>, vector<32x32xf32>, vector<16x32xf32> -> vector<16x32xf32>
    %75 = arith.addf %70, %74 : vector<16x32xf32>
    %76 = vector.shape_cast %68 : vector<2x8x32xf32> to vector<16x32xf32>
    %c0_36 = arith.constant 0 : index
    %c0_37 = arith.constant 0 : index
    %77 = vector.load %arg11[%c0_36, %c0_37] : memref<32x32xf32, #tpu.memory_space<vmem>>, vector<32x32xf32>
    %cst_38 = arith.constant dense<0.000000e+00> : vector<16x32xf32>
    %78 = tpu.matmul %76, %77, %cst_38 {dimension_numbers = #tpu.dot_dimension_numbers<[1], [0], [0], [1], [0, 0, 1, 1], [], []>} : vector<16x32xf32>, vector<32x32xf32>, vector<16x32xf32> -> vector<16x32xf32>
    %79 = arith.addf %75, %78 : vector<16x32xf32>
    %c0_39 = arith.constant 0 : index
    %c0_40 = arith.constant 0 : index
    %80 = vector.load %arg12[%c0_39, %c0_40] : memref<1x32xf32, #tpu.memory_space<vmem>>, vector<1x32xf32>
    %81 = vector.broadcast %80 : vector<1x32xf32> to vector<16x32xf32>
    %82 = arith.addf %79, %81 : vector<16x32xf32>
    %cst_41 = arith.constant 0.000000e+00 : f32
    %83 = vector.broadcast %cst_41 : f32 to vector<16x32xf32>
    %84 = arith.cmpf ogt, %82, %83 : vector<16x32xf32>
    %cst_42 = arith.constant 0.00999999977 : f32
    %85 = vector.broadcast %cst_42 : f32 to vector<16x32xf32>
    %86 = arith.mulf %85, %82 : vector<16x32xf32>
    %87 = arith.select %84, %82, %86 : vector<16x32xi1>, vector<16x32xf32>
    %88 = vector.shape_cast %87 : vector<16x32xf32> to vector<2x8x32xf32>
    %cst_43 = arith.constant dense<0.000000e+00> : vector<2x32xf32>
    %89 = vector.multi_reduction <add>, %88, %cst_43 [1] : vector<2x8x32xf32> to vector<2x32xf32>
    %cst_44 = arith.constant 1.250000e-01 : f32
    %90 = vector.broadcast %cst_44 : f32 to vector<2x32xf32>
    %91 = arith.mulf %89, %90 : vector<2x32xf32>
    %c0_45 = arith.constant 0 : index
    %c0_46 = arith.constant 0 : index
    %92 = vector.load %arg13[%c0_45, %c0_46] : memref<32x2xf32, #tpu.memory_space<vmem>>, vector<32x2xf32>
    %cst_47 = arith.constant dense<0.000000e+00> : vector<2x2xf32>
    %93 = tpu.matmul %91, %92, %cst_47 {dimension_numbers = #tpu.dot_dimension_numbers<[1], [0], [0], [1], [0, 0, 1, 1], [], []>} : vector<2x32xf32>, vector<32x2xf32>, vector<2x2xf32> -> vector<2x2xf32>
    %c0_48 = arith.constant 0 : index
    %c0_49 = arith.constant 0 : index
    %94 = vector.load %arg14[%c0_48, %c0_49] : memref<1x2xf32, #tpu.memory_space<vmem>>, vector<1x2xf32>
    %95 = vector.broadcast %94 : vector<1x2xf32> to vector<2x2xf32>
    %96 = arith.addf %93, %95 : vector<2x2xf32>
    %cst_50 = arith.constant 0.000000e+00 : f32
    %97 = vector.broadcast %cst_50 : f32 to vector<2x9x128xf32>
    %c0_51 = arith.constant 0 : index
    %c0_52 = arith.constant 0 : index
    %c0_53 = arith.constant 0 : index
    %98 = vector.load %arg15[%c0_51, %c0_52, %c0_53] : memref<2x9x128xf32, #tpu.memory_space<vmem>>, vector<2x9x128xf32>
    tpu.vector_store %arg15[%c0_51, %c0_52, %c0_53], %97 {strides = array<i32>} : memref<2x9x128xf32, #tpu.memory_space<vmem>>, vector<2x9x128xf32>,
    %c0_54 = arith.constant 0 : index
    %c0_55 = arith.constant 0 : index
    %c0_56 = arith.constant 0 : index
    %99 = vector.load %arg15[%c0_54, %c0_55, %c0_56] : memref<2x9x128xf32, #tpu.memory_space<vmem>>, vector<2x8x8xf32>
    tpu.vector_store %arg15[%c0_54, %c0_55, %c0_56], %41 {strides = array<i32>} : memref<2x9x128xf32, #tpu.memory_space<vmem>>, vector<2x8x8xf32>,
    %c0_57 = arith.constant 0 : index
    %c0_58 = arith.constant 0 : index
    %c8 = arith.constant 8 : index
    %100 = vector.load %arg15[%c0_57, %c0_58, %c8] : memref<2x9x128xf32, #tpu.memory_space<vmem>>, vector<2x8x1xf32>
    tpu.vector_store %arg15[%c0_57, %c0_58, %c8], %57 {strides = array<i32>} : memref<2x9x128xf32, #tpu.memory_space<vmem>>, vector<2x8x1xf32>,
    %101 = vector.shape_cast %96 : vector<2x2xf32> to vector<2x1x2xf32>
    %c0_59 = arith.constant 0 : index
    %c8_60 = arith.constant 8 : index
    %c0_61 = arith.constant 0 : index
    %102 = vector.load %arg15[%c0_59, %c8_60, %c0_61] : memref<2x9x128xf32, #tpu.memory_space<vmem>>, vector<2x1x2xf32>
    tpu.vector_store %arg15[%c0_59, %c8_60, %c0_61], %101 {strides = array<i32>} : memref<2x9x128xf32, #tpu.memory_space<vmem>>, vector<2x1x2xf32>,
    return
  }
  func.func @transform_0(%arg0: i32) -> (i32, i32, i32) {
    %c0_i32 = arith.constant 0 : i32
    %c0_i32_0 = arith.constant 0 : i32
    %c0_i32_1 = arith.constant 0 : i32
    return %arg0, %c0_i32, %c0_i32_0 : i32, i32, i32
  }
  func.func @transform_1(%arg0: i32) -> (i32, i32) {
    %c0_i32 = arith.constant 0 : i32
    %c0_i32_0 = arith.constant 0 : i32
    %c0_i32_1 = arith.constant 0 : i32
    return %c0_i32, %c0_i32_0 : i32, i32
  }
  func.func @transform_2(%arg0: i32) -> (i32, i32) {
    %c0_i32 = arith.constant 0 : i32
    %c0_i32_0 = arith.constant 0 : i32
    %c0_i32_1 = arith.constant 0 : i32
    return %c0_i32, %c0_i32_0 : i32, i32
  }
  func.func @transform_3(%arg0: i32) -> (i32, i32) {
    %c0_i32 = arith.constant 0 : i32
    %c0_i32_0 = arith.constant 0 : i32
    %c0_i32_1 = arith.constant 0 : i32
    return %c0_i32, %c0_i32_0 : i32, i32
  }
  func.func @transform_4(%arg0: i32) -> (i32, i32) {
    %c0_i32 = arith.constant 0 : i32
    %c0_i32_0 = arith.constant 0 : i32
    %c0_i32_1 = arith.constant 0 : i32
    return %c0_i32, %c0_i32_0 : i32, i32
  }
  func.func @transform_5(%arg0: i32) -> (i32, i32) {
    %c0_i32 = arith.constant 0 : i32
    %c0_i32_0 = arith.constant 0 : i32
    %c0_i32_1 = arith.constant 0 : i32
    return %c0_i32, %c0_i32_0 : i32, i32
  }
  func.func @transform_6(%arg0: i32) -> (i32, i32) {
    %c0_i32 = arith.constant 0 : i32
    %c0_i32_0 = arith.constant 0 : i32
    %c0_i32_1 = arith.constant 0 : i32
    return %c0_i32, %c0_i32_0 : i32, i32
  }
  func.func @transform_7(%arg0: i32) -> (i32, i32) {
    %c0_i32 = arith.constant 0 : i32
    %c0_i32_0 = arith.constant 0 : i32
    %c0_i32_1 = arith.constant 0 : i32
    return %c0_i32, %c0_i32_0 : i32, i32
  }
  func.func @transform_8(%arg0: i32) -> (i32, i32) {
    %c0_i32 = arith.constant 0 : i32
    %c0_i32_0 = arith.constant 0 : i32
    %c0_i32_1 = arith.constant 0 : i32
    return %c0_i32, %c0_i32_0 : i32, i32
  }
  func.func @transform_9(%arg0: i32) -> (i32, i32) {
    %c0_i32 = arith.constant 0 : i32
    %c0_i32_0 = arith.constant 0 : i32
    %c0_i32_1 = arith.constant 0 : i32
    return %c0_i32, %c0_i32_0 : i32, i32
  }
  func.func @transform_10(%arg0: i32) -> (i32, i32) {
    %c0_i32 = arith.constant 0 : i32
    %c0_i32_0 = arith.constant 0 : i32
    %c0_i32_1 = arith.constant 0 : i32
    return %c0_i32, %c0_i32_0 : i32, i32
  }
  func.func @transform_11(%arg0: i32) -> (i32, i32) {
    %c0_i32 = arith.constant 0 : i32
    %c0_i32_0 = arith.constant 0 : i32
    %c0_i32_1 = arith.constant 0 : i32
    return %c0_i32, %c0_i32_0 : i32, i32
  }
  func.func @transform_12(%arg0: i32) -> (i32, i32) {
    %c0_i32 = arith.constant 0 : i32
    %c0_i32_0 = arith.constant 0 : i32
    %c0_i32_1 = arith.constant 0 : i32
    return %c0_i32, %c0_i32_0 : i32, i32
  }
  func.func @transform_13(%arg0: i32) -> (i32, i32) {
    %c0_i32 = arith.constant 0 : i32
    %c0_i32_0 = arith.constant 0 : i32
    %c0_i32_1 = arith.constant 0 : i32
    return %c0_i32, %c0_i32_0 : i32, i32
  }
  func.func @transform_14(%arg0: i32) -> (i32, i32, i32) {
    %c0_i32 = arith.constant 0 : i32
    %c0_i32_0 = arith.constant 0 : i32
    %c0_i32_1 = arith.constant 0 : i32
    return %arg0, %c0_i32, %c0_i32_0 : i32, i32, i32
  }
}

</mosaic_0001>

<bundles_post_ra>
// kernel: tpu_custom_call.1
= control target key start
LH: loop header
LB: loop body
LE: loop exit
PB: predicated region body
PF: predicated region fallthrough
CT: control target
= control target key end

     0   :  { %s1748_s0 = inlined_call_operand.vmem [shape: f32[4,8,32], index: 0, kind: input, shape index: {}]   ;;  %s1749_s1 = inlined_call_operand.vmem [shape: f32[32,32], index: 1, kind: input, shape index: {}]   ;;  %s1750_s2 = inlined_call_operand.vmem [shape: f32[1,32], index: 2, kind: input, shape index: {}]   ;;  %s1751_s3 = inlined_call_operand.hbm [shape: f32[32,64], index: 3, kind: input, shape index: {}]   ;;  %s1752_s4 = inlined_call_operand.vmem [shape: f32[1,64], index: 4, kind: input, shape index: {}]   ;;  %s1753_s5 = inlined_call_operand.vmem [shape: f32[32,1], index: 5, kind: input, shape index: {}]   ;;  %s1754_s6 = inlined_call_operand.<no memory space> [shape: f32[1,1], index: 6, kind: input, shape index: {}]   ;;  %s1755_s7 = inlined_call_operand.vmem [shape: f32[1,32], index: 7, kind: input, shape index: {}]   ;;  %s1756_s8 = inlined_call_operand.hbm [shape: f32[32,32], index: 8, kind: input, shape index: {}]   ;;  %s1757_s9 = inlined_call_operand.hbm [shape: f32[32,32], index: 9, kind: input, shape index: {}]   ;;  %s1758_s10 = inlined_call_operand.hbm [shape: f32[32,32], index: 10, kind: input, shape index: {}]   ;;  %s1759_s11 = inlined_call_operand.vmem [shape: f32[1,32], index: 11, kind: input, shape index: {}]   ;;  %s1760_s12 = inlined_call_operand.vmem [shape: f32[32,2], index: 12, kind: input, shape index: {}]   ;;  %s1761_s13 = inlined_call_operand.vmem [shape: f32[1,2], index: 13, kind: input, shape index: {}]   ;;  %s1762_s14 = inlined_call_operand.vmem [shape: f32[4,9,128], index: 14, kind: output, shape index: {}]  }
   0x1   :  { %1764 = sst [smem:[#allocation13_spill]] %s1751_s3  ;;  %v19_v0 = vstv %s1754_s6 }
   0x2   :  { %1765 = sst [smem:[#allocation14_spill]] %s1756_s8  ;;  %20 = vst [vmem:[#allocation2] sm:$0x1] %v19_v0 }
   0x3   :  { %21 = vsyncpa [#allocation4], 0 }
   0x4   :  { %22 = vsyncpa [#allocation6], 0 }
   0x5   :  { %23 = vsyncpa [#allocation9], 0  ;;  %s1560_s15 = smov 0  }
   0x6 LB: > { %s1763_s16 = sadd.s32 4294967295, %s1470_s15   ;;  %p1214_p0 = scmp.ge.s32.totalorder %s1470_s15, 1  ;;  %s1470_s15 = sphi %s1560_s15, %s29_s15  }
   0x7   : > { %p359_p1 = scmp.lt.s32.totalorder %s1470_s15, 3  ;;  %p1570_p2 = scmp.eq.s32.totalorder %s1763_s16, 0 }
   0x8   : > { %s1767_s8 = sld [smem:[#allocation14_spill]]  ;;  %s1472_s24 = smov [#allocation5]  }
   0x9   : > { %p1577_p3 = pnand %p1214_p0, %p359_p1  ;;  %s1769_s3 = sld [smem:[#allocation13_spill]] }
   0xa   : > { %s404_s25 = sshll.u32 %s1472_s24, 4  ;;  %s1473_s27 = smov [#allocation3]   ;;  %s405_s25 = int_to_ptr.vmem [resolvable:$true] %s404_s25 }
   0xb   : > { %p1268_p4 = pneg %p1577_p3  ;;  %s378_s28 = sshll.u32 %s1473_s27, 4  ;;  %s379_s28 = int_to_ptr.vmem [resolvable:$true] %s378_s28 }
   0xc   : > { %s416_s17 = sshll.u32 %s1757_s9, 4  ;;  %s1474_s18 = smov 128   ;;  %s417_s17 = int_to_ptr.hbm [resolvable:$true] %s416_s17 }
   0xd   : > { %p1588_p5 = pnand %p1570_p2, %p1268_p4  ;;  %s1475_s21 = smov 8  }
   0xe   : > { %s402_s19 = sshll.u32 %s1767_s8, 4  ;;  %s1476_s22 = smov [#allocation7]   ;;  %s403_s19 = int_to_ptr.hbm [resolvable:$true] %s402_s19 }
   0xf   : > { %s376_s23 = sshll.u32 %s1769_s3, 4  ;;  %s418_s24 = sshll.u32 %s1476_s22, 4  ;;  %s377_s23 = int_to_ptr.hbm [resolvable:$true] %s376_s23  ;;  %s419_s24 = int_to_ptr.vmem [resolvable:$true] %s418_s24 }
  0x10   : > { %1274 = dma.hbm_to_vmem [thread:$0]  (!%p1588_p5), %s403_s19, 512, %s405_s25, [#allocation6], %s1474_s18, %s1474_s18, %s1475_s21  }
  0x11   : > { %1271 = dma.hbm_to_vmem [thread:$0]  (!%p1588_p5), %s377_s23, 512, %s379_s28, [#allocation4], %s1474_s18, %s1474_s18, %s1475_s21  }
  0x12   : > { %s430_s8 = sshll.u32 %s1758_s10, 4  ;;  %s1477_s27 = smov [#allocation8]   ;;  %s431_s8 = int_to_ptr.hbm [resolvable:$true] %s430_s8 }
  0x13   : > { %1277 = dma.hbm_to_vmem [thread:$0]  (!%p1588_p5), %s417_s17, 512, %s419_s24, [#allocation6], %s1474_s18, %s1474_s18, %s1475_s21  }
  0x14   : > { %s432_s29 = sshll.u32 %s1477_s27, 4  ;;  %466 = sbr.rel (%p1577_p3) target bundleno = 1192 (0x4a8), region = 76  ;;  %s433_s29 = int_to_ptr.vmem [resolvable:$true] %s432_s29 }
  0x15   : > { %1280 = dma.hbm_to_vmem [thread:$0]  (!%p1588_p5), %s431_s8, 512, %s433_s29, [#allocation9], %s1474_s18, %s1474_s18, %s1475_s21  }
  0x19   : > { %1457 = dma.done.wait (%p1570_p2), [#allocation4], 512  }
  0x1a   : > { %1459 = vsyncadd (%p1570_p2), [#allocation4], 4294966784 }
  0x1b   : > { %1461 = dma.done.wait (%p1570_p2), [#allocation6], 1024  }
  0x1c   : > { %1463 = vsyncadd (%p1570_p2), [#allocation6], 4294966272 }
  0x1d   : > { %1465 = dma.done.wait (%p1570_p2), [#allocation9], 512  }
  0x1e   : > { %1467 = vsyncadd (%p1570_p2), [#allocation9], 4294966784  ;;  %s1771_s3 = sadd.s32 4294967295, %s1470_s15   ;;  %v547_v1 = vld [vmem:[%s1749_s1 + $0x18] sm:$0xff]  ;;  %v546_v2 = vld [vmem:[%s1749_s1 + $0x10] sm:$0xff]  ;;  %vm552_vm0 = vcmask 261120   ;;  %v685_v39 = vlaneseq }
  0x1f   : > { %s1225_s8 = sshll.u32 %s1771_s3, 1  ;;  %571 = vmatpush.msra.mxu0 %v547_v1  ;;  %v545_v3 = vld [vmem:[%s1749_s1 + $0x8] sm:$0xff]  ;;  %v591_v4 = vld [vmem:[#allocation3 + $0x18] sm:$0xff]  ;;  %v590_v8 = vld [vmem:[#allocation3 + $0x10] sm:$0xff]  ;;  %s1478_s3 = smov 96   ;;  %vm692_vm6 = vcmask 64512  }
  0x20   : > { %p530_p6 = scmp.lt.s32.totalorder %s1225_s8, 3  ;;  %614 = vmatpush.msra.mxu1 %v591_v4  ;;  %v544_v5 = vld [vmem:[%s1749_s1] sm:$0xff]  ;;  %v589_v9 = vld [vmem:[#allocation3 + $0x8] sm:$0xff]  ;;  %v827_v12 = vld [vmem:[#allocation5 + $0x10] sm:$0xff]  ;;  %v686_v40 = vshrl.u32 %v685_v39, 7  ;;  %v688_v41 = vand.u32 127, %v685_v39 }
  0x21   : > { %572 = vmatpush.msra.mxu0 %v546_v2  ;;  %v588_v10 = vld [vmem:[#allocation3] sm:$0xff]  ;;  %v828_v11 = vld [vmem:[#allocation5 + $0x18] sm:$0xff]  ;;  %v826_v13 = vld [vmem:[#allocation5 + $0x8] sm:$0xff]  ;;  %vm762_vm7 = vcmask 7168   ;;  %v1479_v62 = vmov 0.0   ;;  %vm1104_vm8 = vcmask 72768  }
  0x22   : > { %s1773_s8 = smov (!%p530_p6, %s1225_s8), 3  ;;  %615 = vmatpush.msra.mxu1 %v590_v8  ;;  %v825_v14 = vld [vmem:[#allocation5] sm:$0xff]  ;;  %v1310_v15 = vld [vmem:[%s1750_s2] ss:$0 sm:$0xff]  ;;  %v734_v33 = vld [vmem:[%s1753_s5 + $0x18] sm:$0xff]  ;;  %vm689_vm5 = vcmp.eq.s32.totalorder %v686_v40, %v688_v41  ;;  %vm1068_vm11 = vcmask 1041409  }
  0x23   : > { %s1226_s16 = sshll.u32 %s1773_s8, 3  ;;  %573 = vmatpush.msra.mxu0 %v545_v3  ;;  %v1311_v24 = vld [vmem:[%s1752_s4] ss:$0 sm:$0xff]  ;;  %v733_v35 = vld [vmem:[%s1753_s5 + $0x10] sm:$0xff]  ;;  %v732_v36 = vld [vmem:[%s1753_s5 + $0x8] sm:$0xff]  ;;  %s1251_s30 = sshll.u32 %s1773_s8, 4 }
  0x24   : > { %s533_s17 = scalar_lea.vmem %s1748_s0, %s1226_s16  ;;  %616 = vmatpush.msra.mxu1 %v589_v9  ;;  %v731_v37 = vld [vmem:[%s1753_s5] sm:$0xff]  ;;  %s1688_s21 = scalar_lea.vmem %s1762_s14, %s1251_s30  ;;  %vm1110_vm12 = vcmask 8192  }
  0x25   : > { %v542_v6 = vld [vmem:[%s533_s17] sm:$0xff]  ;;  %574 = vmatpush.msra.mxu0 %v544_v5  ;;  %v543_v7 = vld [vmem:[%s533_s17 + $0x8] sm:$0xff]  ;;  %1092 = vst [vmem:[%s1688_s21] sm:$0xff] %v1479_v62  ;;  %s1481_s8 = smov 8  }
  0x26   : > { %1230 = vmatmul.msk.f32.vlgmr.msra.gmra.mxu0 %vm552_vm0, %v542_v6  ;;  %617 = vmatpush.msra.mxu1 %v588_v10  ;;  %v1312_v47 = vld [vmem:[#allocation2] ss:$0 sm:$0xff]  ;;  %1094 = vst [vmem:[%s1688_s21 + $0x10] sm:$0xff] %v1479_v62 }
  0x27   : > { %1093 = vst [vmem:[%s1688_s21 + $0x8] sm:$0x1] %v1479_v62 }
  0x28   : > { %984 = vmatpush.msrb.mxu1 %v828_v11  ;;  %1095 = vst [vmem:[%s1688_s21 + $0x18] sm:$0x1] %v1479_v62 }
  0x2a   : > { %985 = vmatpush.msrb.mxu1 %v827_v12 }
  0x2c   : > { %986 = vmatpush.msrb.mxu1 %v826_v13 }
  0x2e   : > { %1231 = vmatmul.msk.f32.gmra.mxu0 %vm552_vm0, %v543_v7  ;;  %987 = vmatpush.msrb.mxu1 %v825_v14 }
  0xa3   : > { %v576_v16 = vpop.f32.mrf.mxu0 }
  0xa4   : > { %v577_v17 = vadd.f32 %v1310_v15, %v576_v16 }
  0xa6   : > { %vm582_vm1 = vcmp.gt.f32.partialorder %v577_v17, 0.0  ;;  %v584_v18 = vmul.f32 0.01, %v577_v17 }
  0xa8   : > { %v1645_v19 = vsel %vm582_vm1, %v577_v17, %v584_v18 }
  0xa9   : > { %1232 = vmatmul.msk.f32.vlgmr.msra.gmra.mxu1 %vm552_vm0, %v1645_v19 }
  0xab   : > { %v579_v20 = vpop.f32.mrf.mxu0 }
  0xac   : > { %v580_v21 = vadd.f32 %v1310_v15, %v579_v20 }
  0xae   : > { %vm583_vm2 = vcmp.gt.f32.partialorder %v580_v21, 0.0  ;;  %v585_v22 = vmul.f32 0.01, %v580_v21 }
  0xb0   : > { %v1649_v23 = vsel %vm583_vm2, %v580_v21, %v585_v22 }
  0xb1   : > { %1233 = vmatmul.msk.f32.gmra.mxu1 %vm552_vm0, %v1649_v23 }
  0xb9   : > { %1244 = vmatmul.msk.f32.vlgmr.msrb.gmra.mxu1 %vm552_vm0, %v1645_v19 }
  0xc1   : > { %1245 = vmatmul.msk.f32.gmra.mxu1 %vm552_vm0, %v1649_v23 }
 0x126   : > { %v619_v25 = vpop.f32.mrf.mxu1 }
 0x127   : > { %v620_v26 = vadd.f32 %v1311_v24, %v619_v25 }
 0x129   : > { %vm625_vm3 = vcmp.gt.f32.partialorder %v620_v26, 0.0  ;;  %v627_v27 = vmul.f32 0.01, %v620_v26 }
 0x12b   : > { %v629_v28 = vsel %vm625_vm3, %v620_v26, %v627_v27 }
 0x12c   : > { %632 = vrot.lane.b32.xlu0 %v629_v28, %s1478_s3 }
 0x12e   : > { %v622_v29 = vpop.f32.mrf.mxu1 }
 0x12f   : > { %v623_v30 = vadd.f32 %v1311_v24, %v622_v29  ;;  %v1480_v24 = vmov 0  }
 0x130   : > { %1307 = vset.pattern.permute.xlu2 %v1480_v24  ;;  %1309 = vset.pattern.permute.xlu0 %v1480_v24 }
 0x131   : > { %v628_v31 = vmul.f32 0.01, %v623_v30  ;;  %vm626_vm4 = vcmp.gt.f32.partialorder %v623_v30, 0.0 }
 0x133   : > { %v630_v32 = vsel %vm626_vm4, %v623_v30, %v628_v31 }
 0x134   : > { %659 = vrot.lane.b32.xlu0 %v630_v32, %s1478_s3 }
 0x19e   : > { %v633_v34 = vpop.permute.xlu0 %632 }
 0x19f   : > { %1234 = vmatpush.xpose.msk.msra.mxu2 %vm552_vm0, %v633_v34 }
 0x1a2   : > { %1235 = vmatmul.msk.f32.vlgmr.msra.gmra.mxu2 %vm552_vm0, %v629_v28 }
 0x1a3   : > { %751 = vmatpush.msrb.mxu2 %v734_v33 }
 0x1a5   : > { %752 = vmatpush.msrb.mxu2 %v733_v35 }
 0x1a6   : > { %v660_v38 = vpop.permute.xlu0 %659 }
 0x1a7   : > { %753 = vmatpush.msrb.mxu2 %v732_v36  ;;  %1236 = vmatpush.xpose.msk.msra.mxu3 %vm552_vm0, %v660_v38 }
 0x1a9   : > { %754 = vmatpush.msrb.mxu2 %v731_v37 }
 0x1aa   : > { %1237 = vmatmul.msk.f32.vlgmr.msra.gmra.mxu3 %vm552_vm0, %v630_v32  ;;  %1238 = vmatmul.msk.f32.vlgmr.msrb.gmra.mxu2 %vm552_vm0, %v1645_v19 }
 0x1ab   : > { %879 = vmatpush.msrb.mxu3 %v1645_v19 }
 0x1ad   : > { %934 = vmatpush.msra.mxu3 %v1649_v23 }
 0x1b2   : > { %1239 = vmatmul.msk.f32.gmra.mxu2 %vm552_vm0, %v1649_v23 }
 0x225   : > { %v655_v42 = vpop.f32.mrf.mxu2 }
 0x226   : > { %v690_v43 = vsel %vm689_vm5, -9999999.0, %v655_v42 }
 0x227   : > { %v693_v44 = vsel %vm692_vm6, %v690_v43, -inf }
 0x228   : > { %v694_v45 = vrot.slane %v693_v44, 4 }
 0x22a   : > { %v695_v46 = vmax.f32 %v693_v44, %v694_v45 }
 0x22c   : > { %v696_v48 = vrot.slane %v695_v46, 2 }
 0x22d   : > { %v682_v49 = vpop.f32.mrf.mxu3  ;;  %v756_v50 = vpop.f32.mrf.mxu2 }
 0x22e   : > { %v697_v51 = vmax.f32 %v695_v46, %v696_v48  ;;  %v691_v52 = vsel %vm689_vm5, -9999999.0, %v682_v49  ;;  %v757_v53 = vadd.f32 %v1312_v47, %v756_v50 }
 0x22f   : > { %v700_v54 = vsel %vm692_vm6, %v691_v52, -inf }
 0x230   : > { %v698_v55 = vrot.slane %v697_v51, 1  ;;  %v701_v56 = vrot.slane %v700_v54, 4  ;;  %v763_v57 = vsel %vm762_vm7, %v757_v53, -inf }
 0x231   : > { %v764_v58 = vrot.slane %v763_v57, 4 }
 0x232   : > { %v699_v59 = vmax.f32 %v697_v51, %v698_v55  ;;  %v702_v60 = vmax.f32 %v700_v54, %v701_v56 }
 0x233   : > { %v765_v61 = vmax.f32 %v763_v57, %v764_v58 }
 0x234   : > { %v707_v63 = vsub.f32 %v690_v43, %v699_v59  ;;  %v703_v0 = vrot.slane %v702_v60, 2 }
 0x235   : > { %v766_v1 = vrot.slane %v765_v61, 2  ;;  %v759_v2 = vpop.f32.mrf.mxu2 }
 0x236   : > { %v709_v3 = vmul.f32 1.442695, %v707_v63  ;;  %v704_v4 = vmax.f32 %v702_v60, %v703_v0  ;;  %v760_v5 = vadd.f32 %v1312_v47, %v759_v2 }
 0x237   : > { %v767_v6 = vmax.f32 %v765_v61, %v766_v1 }
 0x238   : > { %1316 = vpow2.f32 %v709_v3  ;;  %v705_v7 = vrot.slane %v704_v4, 1  ;;  %v770_v8 = vsel %vm762_vm7, %v760_v5, -inf }
 0x239   : > { %v768_v9 = vrot.slane %v767_v6, 1  ;;  %v771_v10 = vrot.slane %v770_v8, 4 }
 0x23a   : > { %v706_v11 = vmax.f32 %v704_v4, %v705_v7  ;;  %v996_v7 = vld [vmem:[#allocation8 + $0x8] sm:$0xff] }
 0x23b   : > { %v769_v12 = vmax.f32 %v767_v6, %v768_v9  ;;  %v772_v13 = vmax.f32 %v770_v8, %v771_v10  ;;  %v997_v6 = vld [vmem:[#allocation8 + $0x10] sm:$0xff]  ;;  %v995_v8 = vld [vmem:[#allocation8] sm:$0xff] }
 0x23c   : > { %v708_v14 = vsub.f32 %v691_v52, %v706_v11 }
 0x23d   : > { %v777_v15 = vsub.f32 %v757_v53, %v769_v12  ;;  %v773_v16 = vrot.slane %v772_v13, 2 }
 0x23e   : > { %v1317_v17 = vpop.eup %1316  ;;  %v711_v18 = vmul.f32 1.442695, %v708_v14 }
 0x23f   : > { %v713_v20 = vsel %vm692_vm6, %v1317_v17, 0.0  ;;  %v779_v21 = vmul.f32 1.442695, %v777_v15  ;;  %v774_v22 = vmax.f32 %v772_v13, %v773_v16 }
 0x240   : > { %v714_v25 = vrot.slane %v713_v20, 4  ;;  %1318 = vpow2.f32 %v711_v18  ;;  %v941_v18 = vld [vmem:[#allocation7 + $0x10] sm:$0xff] }
 0x241   : > { %1320 = vpow2.f32 %v779_v21  ;;  %v775_v26 = vrot.slane %v774_v22, 1  ;;  %v939_v21 = vld [vmem:[#allocation7] sm:$0xff] }
 0x242   : > { %v715_v27 = vadd.f32 %v714_v25, %v713_v20  ;;  %v940_v20 = vld [vmem:[#allocation7 + $0x8] sm:$0xff] }
 0x243   : > { %v776_v28 = vmax.f32 %v774_v22, %v775_v26 }
 0x244   : > { %v716_v29 = vrot.slane %v715_v27, 2 }
 0x245   : > { %v778_v34 = vsub.f32 %v760_v5, %v776_v28  ;;  %v998_v5 = vld [vmem:[#allocation8 + $0x18] sm:$0xff] }
 0x246   : > { %v1319_v30 = vpop.eup %1318  ;;  %v717_v31 = vadd.f32 %v716_v29, %v715_v27  ;;  %1017 = vmatpush.msra.mxu2 %v998_v5 }
 0x247   : > { %v1321_v32 = vpop.eup %1320  ;;  %v720_v33 = vsel %vm692_vm6, %v1319_v30, 0.0  ;;  %v781_v41 = vmul.f32 1.442695, %v778_v34  ;;  %v989_v34 = vpop.f32.mrf.mxu1 }
 0x248   : > { %v721_v35 = vrot.slane %v720_v33, 4  ;;  %v783_v36 = vsel %vm762_vm7, %v1321_v32, 0.0  ;;  %v718_v37 = vrot.slane %v717_v31, 1  ;;  %1018 = vmatpush.msra.mxu2 %v997_v6 }
 0x249   : > { %v784_v40 = vrot.slane %v783_v36, 4 }
 0x24a   : > { %v722_v38 = vadd.f32 %v721_v35, %v720_v33  ;;  %v719_v39 = vadd.f32 %v718_v37, %v717_v31  ;;  %1019 = vmatpush.msra.mxu2 %v996_v7  ;;  %v1060_v31 = vld [vmem:[%s1760_s12 + $0x10] sm:$0xff]  ;;  %v1058_v33 = vld [vmem:[%s1760_s12] sm:$0xff] }
 0x24b   : > { %v785_v44 = vadd.f32 %v784_v40, %v783_v36 }
 0x24c   : > { %v723_v42 = vrot.slane %v722_v38, 2  ;;  %1322 = vrcp.f32 %v719_v39  ;;  %1020 = vmatpush.msra.mxu2 %v995_v8 }
 0x24d   : > { %1324 = vpow2.f32 %v781_v41  ;;  %v786_v48 = vrot.slane %v785_v44, 2 }
 0x24e   : > { %v724_v43 = vadd.f32 %v723_v42, %v722_v38  ;;  %v1314_v38 = vld [vmem:[%s1759_s11] ss:$0 sm:$0xff] }
 0x24f   : > { %v787_v52 = vadd.f32 %v786_v48, %v785_v44  ;;  %v992_v42 = vpop.f32.mrf.mxu1 }
 0x250   : > { %v725_v45 = vrot.slane %v724_v43, 1 }
 0x251   : > { %v788_v57 = vrot.slane %v787_v52, 1 }
 0x252   : > { %v1323_v46 = vpop.eup %1322  ;;  %v726_v47 = vadd.f32 %v725_v45, %v724_v43 }
 0x253   : > { %v729_v49 = vmul.f32 %v1323_v46, %v1317_v17  ;;  %v1325_v50 = vpop.eup %1324  ;;  %v789_v60 = vadd.f32 %v788_v57, %v787_v52 }
 0x254   : > { %1326 = vrcp.f32 %v726_v47  ;;  %v790_v53 = vsel %vm762_vm7, %v1325_v50, 0.0 }
 0x255   : > { %829 = vxpose.xlu1.b32.start.end [1/1] (short) (narrow) %v729_v49, 8  ;;  %v817_v51 = vsel %vm692_vm6, %v729_v49, 0.0  ;;  %1096 = vst.msk [vmem:[%s1688_s21] sm:$0xff] %vm692_vm6, %v729_v49  ;;  %v791_v55 = vrot.slane %v790_v53, 4  ;;  %1328 = vrcp.f32 %v789_v60 }
 0x256   : > { %818 = vadd.xlane.f32.xlu2 %v817_v51 }
 0x257   : > { %v792_v59 = vadd.f32 %v791_v55, %v790_v53 }
 0x259   : > { %v793_v61 = vrot.slane %v792_v59, 2 }
 0x25a   : > { %v1327_v54 = vpop.eup %1326 }
 0x25b   : > { %v730_v56 = vmul.f32 %v1327_v54, %v1319_v30  ;;  %v794_v62 = vadd.f32 %v793_v61, %v792_v59  ;;  %v1329_v63 = vpop.eup %1328  ;;  %v1061_v30 = vld [vmem:[%s1760_s12 + $0x18] sm:$0xff] }
 0x25c   : > { %v799_v1 = vmul.f32 %v1329_v63, %v1321_v32  ;;  %v1059_v32 = vld [vmem:[%s1760_s12 + $0x8] sm:$0xff] }
 0x25d   : > { %884 = vxpose.xlu1.b32.start.end [1/1] (short) (narrow) %v730_v56, 8  ;;  %v820_v58 = vsel %vm692_vm6, %v730_v56, 0.0  ;;  %1097 = vst.msk [vmem:[%s1688_s21 + $0x10] sm:$0xff] %vm692_vm6, %v730_v56  ;;  %v795_v0 = vrot.slane %v794_v62, 1 }
 0x25e   : > { %821 = vadd.xlane.f32.xlu0 %v820_v58 }
 0x25f   : > { %v796_v2 = vadd.f32 %v795_v0, %v794_v62 }
 0x261   : > { %1330 = vrcp.f32 %v796_v2 }
 0x267   : > { %v1331_v3 = vpop.eup %1330 }
 0x268   : > { %v800_v4 = vmul.f32 %v1331_v3, %v1325_v50 }
 0x26e   : > { %804 = vperm.xlu2 %1307, %v799_v1  }
 0x276   : > { %1098 = vrot.lane.b32.xlu2 %v799_v1, %s1481_s8 }
 0x27e   : > { %1100 = vrot.lane.b32.xlu2 %v800_v4, %s1481_s8 }
 0x2b0   : > { %1308 = vset.pattern.permute.xlu1 %v1480_v24 }
 0x2b7   : > { %809 = vperm.xlu1 %1308, %v800_v4   ;;  %v1315_v4 = vld [vmem:[%s1761_s13] ss:$0 sm:$0xff] }
 0x2c9   : > { %v819_v9 = vpop.xlane.xlu2 %818 }
 0x2ca   : > { %v823_v10 = vmul.f32 %v819_v9, %v1645_v19  ;;  %v942_v19 = vld [vmem:[#allocation7 + $0x18] sm:$0xff] }
 0x2cb   : > { %961 = vmatpush.msrb.mxu0 %v942_v19 }
 0x2cc   : > { %1246 = vmatmul.msk.f32.vlgmr.msra.gmra.mxu2 %vm552_vm0, %v823_v10 }
 0x2cd   : > { %962 = vmatpush.msrb.mxu0 %v941_v18 }
 0x2cf   : > { %963 = vmatpush.msrb.mxu0 %v940_v20 }
 0x2d1   : > { %v805_v11 = vpop.permute.xlu2 %804  ;;  %v822_v12 = vpop.xlane.xlu0 %821  ;;  %964 = vmatpush.msrb.mxu0 %v939_v21 }
 0x2d2   : > { %v824_v13 = vmul.f32 %v822_v12, %v1649_v23  ;;  %v1313_v23 = vld [vmem:[%s1755_s7] ss:$0 sm:$0xff] }
 0x2d3   : > { %v815_v22 = vmul.f32 %v1313_v23, %v805_v11 }
 0x2d4   : > { %1247 = vmatmul.msk.f32.gmra.mxu2 %vm552_vm0, %v824_v13 }
 0x2d9   : > { %v1099_v14 = vpop.permute.xlu2 %1098 }
 0x2da   : > { %1105 = vst.msk [vmem:[%s1688_s21] sm:$0xff] %vm1104_vm8, %v1099_v14 }
 0x2e1   : > { %v1101_v15 = vpop.permute.xlu2 %1100 }
 0x2e2   : > { %1106 = vst.msk [vmem:[%s1688_s21 + $0x10] sm:$0xff] %vm1104_vm8, %v1101_v15 }
 0x2f9   : > { %v845_v16 = vpop.trf.xlu1 }
 0x2fa   : > { %1240 = vmatmul.msk.f32.vlgmr.msrb.gmra.mxu3 %vm692_vm6, %v845_v16 }
 0x2fb   : > { %1084 = vmatpush.msrb.mxu3 %v1061_v30 }
 0x2fd   : > { %1085 = vmatpush.msrb.mxu3 %v1060_v31 }
 0x2ff   : > { %1086 = vmatpush.msrb.mxu3 %v1059_v32 }
 0x301   : > { %v900_v17 = vpop.trf.xlu1  ;;  %1087 = vmatpush.msrb.mxu3 %v1058_v33 }
 0x302   : > { %1241 = vmatmul.msk.f32.vlgmr.msra.gmra.mxu3 %vm692_vm6, %v900_v17 }
 0x329   : > { %v810_v26 = vpop.permute.xlu1 %809 }
 0x32a   : > { %v816_v27 = vmul.f32 %v1313_v23, %v810_v26 }
 0x34f   : > { %v1022_v35 = vpop.f32.mrf.mxu2 }
 0x357   : > { %v1025_v46 = vpop.f32.mrf.mxu2 }
 0x37d   : > { %v881_v24 = vpop.f32.mrf.mxu3 }
 0x37e   : > { %v882_v25 = vadd.f32 %v881_v24, %v815_v22 }
 0x380   : > { %1242 = vmatmul.msk.f32.vlgmr.msrb.gmra.mxu0 %vm552_vm0, %v882_v25 }
 0x385   : > { %v936_v28 = vpop.f32.mrf.mxu3 }
 0x386   : > { %v937_v29 = vadd.f32 %v936_v28, %v816_v27 }
 0x388   : > { %1243 = vmatmul.msk.f32.gmra.mxu0 %vm552_vm0, %v937_v29 }
 0x3fd   : > { %v966_v36 = vpop.f32.mrf.mxu0 }
 0x3fe   : > { %v990_v37 = vadd.f32 %v989_v34, %v966_v36 }
 0x400   : > { %v1028_v39 = vadd.f32 %v1022_v35, %v990_v37 }
 0x402   : > { %v1034_v40 = vadd.f32 %v1314_v38, %v1028_v39 }
 0x404   : > { %vm1036_vm9 = vcmp.gt.f32.partialorder %v1034_v40, 0.0  ;;  %v1038_v41 = vmul.f32 0.01, %v1034_v40 }
 0x405   : > { %v969_v43 = vpop.f32.mrf.mxu0 }
 0x406   : > { %v1040_v44 = vsel %vm1036_vm9, %v1034_v40, %v1038_v41  ;;  %v993_v45 = vadd.f32 %v992_v42, %v969_v43 }
 0x407   : > { %v1042_v47 = vsel %vm552_vm0, %v1040_v44, 0.0 }
 0x408   : > { %v1043_v48 = vrot.slane %v1042_v47, 4  ;;  %v1029_v49 = vadd.f32 %v1025_v46, %v993_v45 }
 0x40a   : > { %v1044_v50 = vadd.f32 %v1043_v48, %v1042_v47  ;;  %v1035_v51 = vadd.f32 %v1314_v38, %v1029_v49 }
 0x40c   : > { %v1045_v52 = vrot.slane %v1044_v50, 2  ;;  %vm1037_vm10 = vcmp.gt.f32.partialorder %v1035_v51, 0.0  ;;  %v1039_v53 = vmul.f32 0.01, %v1035_v51 }
 0x40e   : > { %v1041_v54 = vsel %vm1037_vm10, %v1035_v51, %v1039_v53  ;;  %v1046_v57 = vadd.f32 %v1045_v52, %v1044_v50 }
 0x40f   : > { %v1049_v55 = vsel %vm552_vm0, %v1041_v54, 0.0 }
 0x410   : > { %v1050_v56 = vrot.slane %v1049_v55, 4  ;;  %v1047_v60 = vrot.slane %v1046_v57, 1 }
 0x412   : > { %v1051_v58 = vadd.f32 %v1050_v56, %v1049_v55  ;;  %v1048_v62 = vadd.f32 %v1047_v60, %v1046_v57 }
 0x414   : > { %v1052_v59 = vrot.slane %v1051_v58, 2  ;;  %v1056_v1 = vmul.f32 0.125, %v1048_v62 }
 0x416   : > { %v1053_v61 = vadd.f32 %v1052_v59, %v1051_v58 }
 0x418   : > { %v1054_v63 = vrot.slane %v1053_v61, 1 }
 0x41a   : > { %v1055_v0 = vadd.f32 %v1054_v63, %v1053_v61 }
 0x41c   : > { %v1057_v2 = vmul.f32 0.125, %v1055_v0 }
 0x41e   : > { %v1069_v3 = vsel %vm1068_vm11, %v1057_v2, %v1056_v1 }
 0x41f   : > { %1248 = vmatmul.msk.f32.vlgmr.msrb.gmra.mxu3 %vm552_vm0, %v1069_v3 }
 0x4a2   : > { %v1089_v5 = vpop.f32.mrf.mxu3 }
 0x4a3   : > { %v1090_v6 = vadd.f32 %v1315_v4, %v1089_v5 }
 0x4a5   : > { %v1108_v7 = vrot.slane %v1090_v6, 1  ;;  %1111 = vst.msk [vmem:[%s1688_s21 + $0x8] sm:$0x1] %vm1110_vm12, %v1090_v6 }
 0x4a7   : > { %1112 = vst.msk [vmem:[%s1688_s21 + $0x18] sm:$0x1] %vm1110_vm12, %v1108_v7 }
 0x4a8 PF: > { %s29_s15 = sadd.s32 1, %s1470_s15  }
 0x4a9   : > { %p26_p7 = scmp.ge.s32.totalorder %s29_s15, 4  }
 0x4ab   :  { %28 = sbr.rel (!%p26_p7) target bundleno = 6 (0x6), region = 123 }
 0x4b0   :  { %1137 = vsyncpa [#allocation4], 1 }
 0x4b1   :  { %1139 = vsyncpa [#allocation4 + $0x1], 1 }
 0x4b2   :  { %1140 = vsyncpa [#allocation6], 1 }
 0x4b3   :  { %1141 = vsyncpa [#allocation9], 1 }

</bundles_post_ra>
